<compile_context>
chip_gen: v6e
topology: v6e:2x2x1
jax: 0.10.0
libtpu: 0.0.40
codegen_flags: <defaults>
</compile_context>

<pallas_src>
import jax
import jax.numpy as jnp
import numpy as np
from jax.experimental import pallas as pl
from jax.experimental.pallas import tpu as pltpu

NEG_SLOPE = 0.01  # F.leaky_relu default


def _leaky_relu(x):
    return jnp.where(x > 0, x, NEG_SLOPE * x)


def _masked_out_and_pool(h, valid3, any2):
    """h: (T, L, H) f32; valid3: (T, L, 1) bool; any2: (T, 1) bool."""
    out = jnp.where(valid3, h, 0.0)                 # (T, L, H)
    neg = jnp.where(valid3, h, -jnp.inf)
    pool = jnp.max(neg, axis=1)                     # (T, H)
    pool = jnp.where(any2, pool, 0.0)               # zero if no valid vector
    return out, pool


def subgraph_kernel(x_ref, m_ref, w1_ref, b1_ref,
                    w2a_ref, w2b_ref, b2_ref,
                    w3a_ref, w3b_ref, b3_ref, out_ref):
    T, L, S3 = x_ref.shape
    H = w1_ref.shape[1]
    cdt = w1_ref.dtype            # MXU input dtype (f32, or bf16 if enabled)

    m = m_ref[...]                                   # (T, L) f32 in {0, 1}
    valid3 = m[:, :, None] > 0.5                     # (T, L, 1) bool (hoisted)
    any2 = jnp.max(m, axis=1, keepdims=True) > 0.0   # (T, 1) bool

    # ---- MLP1: h = leaky_relu(x @ W1 + b1) --------------------------------
    x2 = x_ref[...].reshape(T * L, S3).astype(cdt)
    z1 = jnp.dot(x2, w1_ref[...], preferred_element_type=jnp.float32)
    z1 = (z1 + b1_ref[...]).reshape(T, L, H)
    out1, pool1 = _masked_out_and_pool(_leaky_relu(z1), valid3, any2)

    # ---- MLP2: concat([out, pool]) @ W2 == out @ W2a + pool @ W2b ---------
    z2 = jnp.dot(out1.reshape(T * L, H).astype(cdt), w2a_ref[...],
                 preferred_element_type=jnp.float32)
    z2 = (z2 + b2_ref[...]).reshape(T, L, H)
    p2 = jnp.dot(pool1.astype(cdt), w2b_ref[...],
                 preferred_element_type=jnp.float32)        # (T, H), once/polyline
    z2 = z2 + p2[:, None, :]
    out2, pool2 = _masked_out_and_pool(_leaky_relu(z2), valid3, any2)

    # ---- MLP3: only the pooled half of the output is needed ---------------
    z3 = jnp.dot(out2.reshape(T * L, H).astype(cdt), w3a_ref[...],
                 preferred_element_type=jnp.float32)
    z3 = (z3 + b3_ref[...]).reshape(T, L, H)
    p3 = jnp.dot(pool2.astype(cdt), w3b_ref[...],
                 preferred_element_type=jnp.float32)
    z3 = z3 + p3[:, None, :]
    _, pool3 = _masked_out_and_pool(_leaky_relu(z3), valid3, any2)

    out_ref[...] = pool3.astype(out_ref.dtype)       # (T, H)


def _round_up(a, m):
    return (a + m - 1) // m * m


def subgraph_forward(input_var, input_mask, params, *,
                     block_polylines=128, use_bf16=False):
    (w1, b1), (w2, b2), (w3, b3) = params
    B, N, L, S3 = input_var.shape
    H = w1.shape[1]
    BN = B * N

    # T polylines per grid step (multiple of 8 so the mask/out blocks tile).
    T = min(block_polylines, _round_up(BN, 8))
    BN_pad = _round_up(BN, T)
    nblk = BN_pad // T

    x = input_var.reshape(BN, L, S3).astype(jnp.float32)
    m = input_mask.reshape(BN, L).astype(jnp.float32)
    if BN_pad != BN:
        x = jnp.pad(x, ((0, BN_pad - BN), (0, 0), (0, 0)))
        m = jnp.pad(m, ((0, BN_pad - BN), (0, 0)))   # padded rows -> all invalid

    # Split W2/W3 so the [out, pool] concat becomes two matmuls.
    w2a, w2b = w2[:H], w2[H:]
    w3a, w3b = w3[:H], w3[H:]

    wdt = jnp.bfloat16 if use_bf16 else jnp.float32
    if use_bf16:
        x = x.astype(jnp.bfloat16)
    w1c, w2ac, w2bc, w3ac, w3bc = (a.astype(wdt) for a in (w1, w2a, w2b, w3a, w3b))
    b1c, b2c, b3c = (b.astype(jnp.float32) for b in (b1, b2, b3))

    const2d = lambda i: (0, 0)   # weights stay VMEM-resident across the grid
    out = pl.pallas_call(
        subgraph_kernel,
        out_shape=jax.ShapeDtypeStruct((BN_pad, H), jnp.float32),
        grid=(nblk,),
        in_specs=[
            pl.BlockSpec((T, L, S3), lambda i: (i, 0, 0)),   # x slab
            pl.BlockSpec((T, L), lambda i: (i, 0)),          # mask slab
            pl.BlockSpec((S3, H), const2d),                  # W1
            pl.BlockSpec((1, H), const2d),                   # b1
            pl.BlockSpec((H, H), const2d),                   # W2[:H]  (out half)
            pl.BlockSpec((H, H), const2d),                   # W2[H:]  (pool half)
            pl.BlockSpec((1, H), const2d),                   # b2
            pl.BlockSpec((H, H), const2d),                   # W3[:H]
            pl.BlockSpec((H, H), const2d),                   # W3[H:]
            pl.BlockSpec((1, H), const2d),                   # b3
        ],
        out_specs=pl.BlockSpec((T, H), lambda i: (i, 0)),
        compiler_params=pltpu.CompilerParams(
            dimension_semantics=("parallel",)),
    )(x, m, w1c, b1c, w2ac, w2bc, b2c, w3ac, w3bc, b3c)

    return out[:BN].reshape(B, N, H)


# ---------------- pure-JAX reference (mirrors the PyTorch code) -------------
def _mlp_ref(x, mask, w, b):
    h = x @ w + b
    h = jnp.where(h > 0, h, NEG_SLOPE * h)
    m = mask[..., None]
    out = jnp.where(m, h, 0.0)
    neg = jnp.where(m, h, -jnp.inf)
    pool = jnp.max(neg, axis=2, keepdims=True)
    any_v = jnp.any(mask, axis=2)[..., None, None]
    pool = jnp.where(any_v, pool, 0.0)
    rep = jnp.broadcast_to(pool, out.shape)
    return jnp.concatenate([out, rep], axis=-1)


def _subgraph_ref(x, mask, params, hidden):
    (w1, b1), (w2, b2), (w3, b3) = params
    n1 = _mlp_ref(x, mask, w1, b1)
    n2 = _mlp_ref(n1, mask, w2, b2)
    n3 = _mlp_ref(n2, mask, w3, b3)
    out = n3[:, :, 0, -hidden:]
    return jnp.where(jnp.any(mask, axis=2)[..., None], out, 0.0)


if __name__ == "__main__":
    B, N, L, SIZE3, HIDDEN = 2, 4, 8, 16, 32

    key = jax.random.PRNGKey(0)
    k_in, k1, k2, k3, kb1, kb2, kb3, k_in2, k_len2 = jax.random.split(key, 9)

    def linear_params(kw, kb, fan_in, fan_out):
        lim = 1.0 / np.sqrt(fan_in)
        w = jax.random.uniform(kw, (fan_in, fan_out), jnp.float32, -lim, lim)
        b = jax.random.uniform(kb, (1, fan_out), jnp.float32, -lim, lim)
        return w, b

    params = (
        linear_params(k1, kb1, SIZE3, HIDDEN),        # MLP1
        linear_params(k2, kb2, 2 * HIDDEN, HIDDEN),   # MLP2
        linear_params(k3, kb3, 2 * HIDDEN, HIDDEN),   # MLP3
    )

    # --- test 1: small shape, single grid step -------------------------------
    input_var = jax.random.normal(k_in, (B, N, L, SIZE3), dtype=jnp.float32)
    lengths = jnp.array([[8, 5, 0, 3], [1, 8, 4, 0]], dtype=jnp.int32)
    input_mask = jnp.arange(L)[None, None, :] < lengths[:, :, None]   # (B,N,L) bool

    out = jax.block_until_ready(subgraph_forward(input_var, input_mask, params))
    ref = jax.block_until_ready(_subgraph_ref(input_var, input_mask, params, HIDDEN))
    np.testing.assert_allclose(np.asarray(out), np.asarray(ref),
                               rtol=1e-5, atol=1e-5)

    # --- test 2: BN not divisible by block size -> padding + multi-step grid --
    B2, N2 = 2, 11
    input_var2 = jax.random.normal(k_in2, (B2, N2, L, SIZE3), dtype=jnp.float32)
    lengths2 = jax.random.randint(k_len2, (B2, N2), 0, L + 1)
    input_mask2 = jnp.arange(L)[None, None, :] < lengths2[:, :, None]

    out2 = jax.block_until_ready(
        subgraph_forward(input_var2, input_mask2, params, block_polylines=8))
    ref2 = jax.block_until_ready(
        _subgraph_ref(input_var2, input_mask2, params, HIDDEN))
    np.testing.assert_allclose(np.asarray(out2), np.asarray(ref2),
                               rtol=1e-5, atol=1e-5)

    print("KERNEL_OK")
</pallas_src>

<mosaic_0001>
module attributes {stable_mosaic.version = 11 : i64} {
  func.func @subgraph_kernel(%arg0: i32, %arg1: memref<8x8x16xf32, #tpu.memory_space<vmem>>, %arg2: memref<8x8xf32, #tpu.memory_space<vmem>>, %arg3: memref<16x32xf32, #tpu.memory_space<vmem>>, %arg4: memref<1x32xf32, #tpu.memory_space<vmem>>, %arg5: memref<32x32xf32, #tpu.memory_space<vmem>>, %arg6: memref<32x32xf32, #tpu.memory_space<vmem>>, %arg7: memref<1x32xf32, #tpu.memory_space<vmem>>, %arg8: memref<32x32xf32, #tpu.memory_space<vmem>>, %arg9: memref<32x32xf32, #tpu.memory_space<vmem>>, %arg10: memref<1x32xf32, #tpu.memory_space<vmem>>, %arg11: memref<8x32xf32, #tpu.memory_space<vmem>>) attributes {dimension_semantics = [#tpu.dimension_semantics<parallel>], iteration_bounds = array<i64: 1>, scalar_prefetch = 0 : i64, scratch_operands = 0 : i64, tpu.core_type = #tpu.core_type<tc>, window_params = [{transform_indices = @transform_0, window_bounds = array<i64: 8, 8, 16>}, {transform_indices = @transform_1, window_bounds = array<i64: 8, 8>}, {pipeline_mode = #tpu.pipeline_mode<synchronous>, transform_indices = @transform_2, window_bounds = array<i64: 16, 32>}, {pipeline_mode = #tpu.pipeline_mode<synchronous>, transform_indices = @transform_3, window_bounds = array<i64: 1, 32>}, {pipeline_mode = #tpu.pipeline_mode<synchronous>, transform_indices = @transform_4, window_bounds = array<i64: 32, 32>}, {pipeline_mode = #tpu.pipeline_mode<synchronous>, transform_indices = @transform_5, window_bounds = array<i64: 32, 32>}, {pipeline_mode = #tpu.pipeline_mode<synchronous>, transform_indices = @transform_6, window_bounds = array<i64: 1, 32>}, {pipeline_mode = #tpu.pipeline_mode<synchronous>, transform_indices = @transform_7, window_bounds = array<i64: 32, 32>}, {pipeline_mode = #tpu.pipeline_mode<synchronous>, transform_indices = @transform_8, window_bounds = array<i64: 32, 32>}, {pipeline_mode = #tpu.pipeline_mode<synchronous>, transform_indices = @transform_9, window_bounds = array<i64: 1, 32>}, {transform_indices = @transform_10, window_bounds = array<i64: 8, 32>}]} {
    %c0 = arith.constant 0 : index
    %c0_0 = arith.constant 0 : index
    %0 = vector.load %arg2[%c0, %c0_0] : memref<8x8xf32, #tpu.memory_space<vmem>>, vector<8x8xf32>
    %1 = vector.shape_cast %0 : vector<8x8xf32> to vector<8x8x1xf32>
    %cst = arith.constant 5.000000e-01 : f32
    %2 = vector.broadcast %cst : f32 to vector<8x8x1xf32>
    %3 = arith.cmpf ogt, %1, %2 : vector<8x8x1xf32>
    %cst_1 = arith.constant dense<0xFF800000> : vector<8xf32>
    %4 = vector.multi_reduction <maximumf>, %0, %cst_1 [1] : vector<8x8xf32> to vector<8xf32>
    %5 = vector.shape_cast %4 : vector<8xf32> to vector<8x1xf32>
    %cst_2 = arith.constant 0.000000e+00 : f32
    %6 = vector.broadcast %cst_2 : f32 to vector<8x1xf32>
    %7 = arith.cmpf ogt, %5, %6 : vector<8x1xf32>
    %c0_3 = arith.constant 0 : index
    %c0_4 = arith.constant 0 : index
    %c0_5 = arith.constant 0 : index
    %8 = vector.load %arg1[%c0_3, %c0_4, %c0_5] : memref<8x8x16xf32, #tpu.memory_space<vmem>>, vector<8x8x16xf32>
    %9 = vector.shape_cast %8 : vector<8x8x16xf32> to vector<64x16xf32>
    %c0_6 = arith.constant 0 : index
    %c0_7 = arith.constant 0 : index
    %10 = vector.load %arg3[%c0_6, %c0_7] : memref<16x32xf32, #tpu.memory_space<vmem>>, vector<16x32xf32>
    %cst_8 = arith.constant dense<0.000000e+00> : vector<64x32xf32>
    %11 = tpu.matmul %9, %10, %cst_8 {dimension_numbers = #tpu.dot_dimension_numbers<[1], [0], [0], [1], [0, 0, 1, 1], [], []>} : vector<64x16xf32>, vector<16x32xf32>, vector<64x32xf32> -> vector<64x32xf32>
    %c0_9 = arith.constant 0 : index
    %c0_10 = arith.constant 0 : index
    %12 = vector.load %arg4[%c0_9, %c0_10] : memref<1x32xf32, #tpu.memory_space<vmem>>, vector<1x32xf32>
    %13 = vector.broadcast %12 : vector<1x32xf32> to vector<64x32xf32>
    %14 = arith.addf %11, %13 : vector<64x32xf32>
    %15 = vector.shape_cast %14 : vector<64x32xf32> to vector<8x8x32xf32>
    %cst_11 = arith.constant 0.000000e+00 : f32
    %16 = vector.broadcast %cst_11 : f32 to vector<8x8x32xf32>
    %17 = arith.cmpf ogt, %15, %16 : vector<8x8x32xf32>
    %cst_12 = arith.constant 0.00999999977 : f32
    %18 = vector.broadcast %cst_12 : f32 to vector<8x8x32xf32>
    %19 = arith.mulf %18, %15 : vector<8x8x32xf32>
    %20 = arith.select %17, %15, %19 : vector<8x8x32xi1>, vector<8x8x32xf32>
    %cst_13 = arith.constant 0.000000e+00 : f32
    %21 = vector.shape_cast %3 : vector<8x8x1xi1> to vector<8x8x1xi1>
    %22 = vector.broadcast %21 : vector<8x8x1xi1> to vector<8x8x32xi1>
    %23 = vector.broadcast %cst_13 : f32 to vector<8x8x32xf32>
    %24 = arith.select %22, %20, %23 : vector<8x8x32xi1>, vector<8x8x32xf32>
    %cst_14 = arith.constant 0xFF800000 : f32
    %25 = vector.shape_cast %3 : vector<8x8x1xi1> to vector<8x8x1xi1>
    %26 = vector.broadcast %25 : vector<8x8x1xi1> to vector<8x8x32xi1>
    %27 = vector.broadcast %cst_14 : f32 to vector<8x8x32xf32>
    %28 = arith.select %26, %20, %27 : vector<8x8x32xi1>, vector<8x8x32xf32>
    %cst_15 = arith.constant dense<0xFF800000> : vector<8x32xf32>
    %29 = vector.multi_reduction <maximumf>, %28, %cst_15 [1] : vector<8x8x32xf32> to vector<8x32xf32>
    %cst_16 = arith.constant 0.000000e+00 : f32
    %30 = vector.shape_cast %7 : vector<8x1xi1> to vector<8x1xi1>
    %31 = vector.broadcast %30 : vector<8x1xi1> to vector<8x32xi1>
    %32 = vector.broadcast %cst_16 : f32 to vector<8x32xf32>
    %33 = arith.select %31, %29, %32 : vector<8x32xi1>, vector<8x32xf32>
    %34 = vector.shape_cast %24 : vector<8x8x32xf32> to vector<64x32xf32>
    %c0_17 = arith.constant 0 : index
    %c0_18 = arith.constant 0 : index
    %35 = vector.load %arg5[%c0_17, %c0_18] : memref<32x32xf32, #tpu.memory_space<vmem>>, vector<32x32xf32>
    %cst_19 = arith.constant dense<0.000000e+00> : vector<64x32xf32>
    %36 = tpu.matmul %34, %35, %cst_19 {dimension_numbers = #tpu.dot_dimension_numbers<[1], [0], [0], [1], [0, 0, 1, 1], [], []>} : vector<64x32xf32>, vector<32x32xf32>, vector<64x32xf32> -> vector<64x32xf32>
    %c0_20 = arith.constant 0 : index
    %c0_21 = arith.constant 0 : index
    %37 = vector.load %arg7[%c0_20, %c0_21] : memref<1x32xf32, #tpu.memory_space<vmem>>, vector<1x32xf32>
    %38 = vector.broadcast %37 : vector<1x32xf32> to vector<64x32xf32>
    %39 = arith.addf %36, %38 : vector<64x32xf32>
    %40 = vector.shape_cast %39 : vector<64x32xf32> to vector<8x8x32xf32>
    %c0_22 = arith.constant 0 : index
    %c0_23 = arith.constant 0 : index
    %41 = vector.load %arg6[%c0_22, %c0_23] : memref<32x32xf32, #tpu.memory_space<vmem>>, vector<32x32xf32>
    %cst_24 = arith.constant dense<0.000000e+00> : vector<8x32xf32>
    %42 = tpu.matmul %33, %41, %cst_24 {dimension_numbers = #tpu.dot_dimension_numbers<[1], [0], [0], [1], [0, 0, 1, 1], [], []>} : vector<8x32xf32>, vector<32x32xf32>, vector<8x32xf32> -> vector<8x32xf32>
    %43 = vector.shape_cast %42 : vector<8x32xf32> to vector<8x1x32xf32>
    %44 = vector.broadcast %43 : vector<8x1x32xf32> to vector<8x8x32xf32>
    %45 = arith.addf %40, %44 : vector<8x8x32xf32>
    %cst_25 = arith.constant 0.000000e+00 : f32
    %46 = vector.broadcast %cst_25 : f32 to vector<8x8x32xf32>
    %47 = arith.cmpf ogt, %45, %46 : vector<8x8x32xf32>
    %cst_26 = arith.constant 0.00999999977 : f32
    %48 = vector.broadcast %cst_26 : f32 to vector<8x8x32xf32>
    %49 = arith.mulf %48, %45 : vector<8x8x32xf32>
    %50 = arith.select %47, %45, %49 : vector<8x8x32xi1>, vector<8x8x32xf32>
    %cst_27 = arith.constant 0.000000e+00 : f32
    %51 = vector.shape_cast %3 : vector<8x8x1xi1> to vector<8x8x1xi1>
    %52 = vector.broadcast %51 : vector<8x8x1xi1> to vector<8x8x32xi1>
    %53 = vector.broadcast %cst_27 : f32 to vector<8x8x32xf32>
    %54 = arith.select %52, %50, %53 : vector<8x8x32xi1>, vector<8x8x32xf32>
    %cst_28 = arith.constant 0xFF800000 : f32
    %55 = vector.shape_cast %3 : vector<8x8x1xi1> to vector<8x8x1xi1>
    %56 = vector.broadcast %55 : vector<8x8x1xi1> to vector<8x8x32xi1>
    %57 = vector.broadcast %cst_28 : f32 to vector<8x8x32xf32>
    %58 = arith.select %56, %50, %57 : vector<8x8x32xi1>, vector<8x8x32xf32>
    %cst_29 = arith.constant dense<0xFF800000> : vector<8x32xf32>
    %59 = vector.multi_reduction <maximumf>, %58, %cst_29 [1] : vector<8x8x32xf32> to vector<8x32xf32>
    %cst_30 = arith.constant 0.000000e+00 : f32
    %60 = vector.shape_cast %7 : vector<8x1xi1> to vector<8x1xi1>
    %61 = vector.broadcast %60 : vector<8x1xi1> to vector<8x32xi1>
    %62 = vector.broadcast %cst_30 : f32 to vector<8x32xf32>
    %63 = arith.select %61, %59, %62 : vector<8x32xi1>, vector<8x32xf32>
    %64 = vector.shape_cast %54 : vector<8x8x32xf32> to vector<64x32xf32>
    %c0_31 = arith.constant 0 : index
    %c0_32 = arith.constant 0 : index
    %65 = vector.load %arg8[%c0_31, %c0_32] : memref<32x32xf32, #tpu.memory_space<vmem>>, vector<32x32xf32>
    %cst_33 = arith.constant dense<0.000000e+00> : vector<64x32xf32>
    %66 = tpu.matmul %64, %65, %cst_33 {dimension_numbers = #tpu.dot_dimension_numbers<[1], [0], [0], [1], [0, 0, 1, 1], [], []>} : vector<64x32xf32>, vector<32x32xf32>, vector<64x32xf32> -> vector<64x32xf32>
    %c0_34 = arith.constant 0 : index
    %c0_35 = arith.constant 0 : index
    %67 = vector.load %arg10[%c0_34, %c0_35] : memref<1x32xf32, #tpu.memory_space<vmem>>, vector<1x32xf32>
    %68 = vector.broadcast %67 : vector<1x32xf32> to vector<64x32xf32>
    %69 = arith.addf %66, %68 : vector<64x32xf32>
    %70 = vector.shape_cast %69 : vector<64x32xf32> to vector<8x8x32xf32>
    %c0_36 = arith.constant 0 : index
    %c0_37 = arith.constant 0 : index
    %71 = vector.load %arg9[%c0_36, %c0_37] : memref<32x32xf32, #tpu.memory_space<vmem>>, vector<32x32xf32>
    %cst_38 = arith.constant dense<0.000000e+00> : vector<8x32xf32>
    %72 = tpu.matmul %63, %71, %cst_38 {dimension_numbers = #tpu.dot_dimension_numbers<[1], [0], [0], [1], [0, 0, 1, 1], [], []>} : vector<8x32xf32>, vector<32x32xf32>, vector<8x32xf32> -> vector<8x32xf32>
    %73 = vector.shape_cast %72 : vector<8x32xf32> to vector<8x1x32xf32>
    %74 = vector.broadcast %73 : vector<8x1x32xf32> to vector<8x8x32xf32>
    %75 = arith.addf %70, %74 : vector<8x8x32xf32>
    %cst_39 = arith.constant 0.000000e+00 : f32
    %76 = vector.broadcast %cst_39 : f32 to vector<8x8x32xf32>
    %77 = arith.cmpf ogt, %75, %76 : vector<8x8x32xf32>
    %cst_40 = arith.constant 0.00999999977 : f32
    %78 = vector.broadcast %cst_40 : f32 to vector<8x8x32xf32>
    %79 = arith.mulf %78, %75 : vector<8x8x32xf32>
    %80 = arith.select %77, %75, %79 : vector<8x8x32xi1>, vector<8x8x32xf32>
    %cst_41 = arith.constant 0xFF800000 : f32
    %81 = vector.shape_cast %3 : vector<8x8x1xi1> to vector<8x8x1xi1>
    %82 = vector.broadcast %81 : vector<8x8x1xi1> to vector<8x8x32xi1>
    %83 = vector.broadcast %cst_41 : f32 to vector<8x8x32xf32>
    %84 = arith.select %82, %80, %83 : vector<8x8x32xi1>, vector<8x8x32xf32>
    %cst_42 = arith.constant dense<0xFF800000> : vector<8x32xf32>
    %85 = vector.multi_reduction <maximumf>, %84, %cst_42 [1] : vector<8x8x32xf32> to vector<8x32xf32>
    %cst_43 = arith.constant 0.000000e+00 : f32
    %86 = vector.shape_cast %7 : vector<8x1xi1> to vector<8x1xi1>
    %87 = vector.broadcast %86 : vector<8x1xi1> to vector<8x32xi1>
    %88 = vector.broadcast %cst_43 : f32 to vector<8x32xf32>
    %89 = arith.select %87, %85, %88 : vector<8x32xi1>, vector<8x32xf32>
    %c0_44 = arith.constant 0 : index
    %c0_45 = arith.constant 0 : index
    %90 = vector.load %arg11[%c0_44, %c0_45] : memref<8x32xf32, #tpu.memory_space<vmem>>, vector<8x32xf32>
    tpu.vector_store %arg11[%c0_44, %c0_45], %89 {strides = array<i32>} : memref<8x32xf32, #tpu.memory_space<vmem>>, vector<8x32xf32>,
    return
  }
  func.func @transform_0(%arg0: i32) -> (i32, i32, i32) {
    %c0_i32 = arith.constant 0 : i32
    %c0_i32_0 = arith.constant 0 : i32
    %c0_i32_1 = arith.constant 0 : i32
    return %arg0, %c0_i32, %c0_i32_0 : i32, i32, i32
  }
  func.func @transform_1(%arg0: i32) -> (i32, i32) {
    %c0_i32 = arith.constant 0 : i32
    %c0_i32_0 = arith.constant 0 : i32
    return %arg0, %c0_i32 : i32, i32
  }
  func.func @transform_2(%arg0: i32) -> (i32, i32) {
    %c0_i32 = arith.constant 0 : i32
    %c0_i32_0 = arith.constant 0 : i32
    %c0_i32_1 = arith.constant 0 : i32
    return %c0_i32, %c0_i32_0 : i32, i32
  }
  func.func @transform_3(%arg0: i32) -> (i32, i32) {
    %c0_i32 = arith.constant 0 : i32
    %c0_i32_0 = arith.constant 0 : i32
    %c0_i32_1 = arith.constant 0 : i32
    return %c0_i32, %c0_i32_0 : i32, i32
  }
  func.func @transform_4(%arg0: i32) -> (i32, i32) {
    %c0_i32 = arith.constant 0 : i32
    %c0_i32_0 = arith.constant 0 : i32
    %c0_i32_1 = arith.constant 0 : i32
    return %c0_i32, %c0_i32_0 : i32, i32
  }
  func.func @transform_5(%arg0: i32) -> (i32, i32) {
    %c0_i32 = arith.constant 0 : i32
    %c0_i32_0 = arith.constant 0 : i32
    %c0_i32_1 = arith.constant 0 : i32
    return %c0_i32, %c0_i32_0 : i32, i32
  }
  func.func @transform_6(%arg0: i32) -> (i32, i32) {
    %c0_i32 = arith.constant 0 : i32
    %c0_i32_0 = arith.constant 0 : i32
    %c0_i32_1 = arith.constant 0 : i32
    return %c0_i32, %c0_i32_0 : i32, i32
  }
  func.func @transform_7(%arg0: i32) -> (i32, i32) {
    %c0_i32 = arith.constant 0 : i32
    %c0_i32_0 = arith.constant 0 : i32
    %c0_i32_1 = arith.constant 0 : i32
    return %c0_i32, %c0_i32_0 : i32, i32
  }
  func.func @transform_8(%arg0: i32) -> (i32, i32) {
    %c0_i32 = arith.constant 0 : i32
    %c0_i32_0 = arith.constant 0 : i32
    %c0_i32_1 = arith.constant 0 : i32
    return %c0_i32, %c0_i32_0 : i32, i32
  }
  func.func @transform_9(%arg0: i32) -> (i32, i32) {
    %c0_i32 = arith.constant 0 : i32
    %c0_i32_0 = arith.constant 0 : i32
    %c0_i32_1 = arith.constant 0 : i32
    return %c0_i32, %c0_i32_0 : i32, i32
  }
  func.func @transform_10(%arg0: i32) -> (i32, i32) {
    %c0_i32 = arith.constant 0 : i32
    %c0_i32_0 = arith.constant 0 : i32
    return %arg0, %c0_i32 : i32, i32
  }
}

</mosaic_0001>

<bundles_post_ra>
// kernel: tpu_custom_call.1
= control target key start
LH: loop header
LB: loop body
LE: loop exit
PB: predicated region body
PF: predicated region fallthrough
CT: control target
= control target key end

     0   :  { %15 = vsyncpa [#allocation3], 0  ;;  %s2092_s0 = inlined_call_operand.hbm [shape: f32[8,8,16], index: 0, kind: input, shape index: {}]   ;;  %s2093_s1 = inlined_call_operand.hbm [shape: f32[8,8], index: 1, kind: input, shape index: {}]   ;;  %s2094_s2 = inlined_call_operand.hbm [shape: f32[16,32], index: 2, kind: input, shape index: {}]   ;;  %s2095_s3 = inlined_call_operand.vmem [shape: f32[1,32], index: 3, kind: input, shape index: {}]   ;;  %s2096_s4 = inlined_call_operand.hbm [shape: f32[32,32], index: 4, kind: input, shape index: {}]   ;;  %s2097_s5 = inlined_call_operand.hbm [shape: f32[32,32], index: 5, kind: input, shape index: {}]   ;;  %s2098_s6 = inlined_call_operand.vmem [shape: f32[1,32], index: 6, kind: input, shape index: {}]   ;;  %s2099_s7 = inlined_call_operand.hbm [shape: f32[32,32], index: 7, kind: input, shape index: {}]   ;;  %s2100_s8 = inlined_call_operand.hbm [shape: f32[32,32], index: 8, kind: input, shape index: {}]   ;;  %s2101_s9 = inlined_call_operand.vmem [shape: f32[1,32], index: 9, kind: input, shape index: {}]   ;;  %s2102_s10 = inlined_call_operand.hbm [shape: f32[8,32], index: 10, kind: output, shape index: {}]  }
   0x1   :  { %16 = vsyncpa [#allocation6], 0 }
   0x2   :  { %17 = vsyncpa [#allocation9], 0 }
   0x3   :  { %18 = vsyncpa [#allocation12], 0 }
   0x4   :  { %19 = vsyncpa [#allocation4], 0  ;;  %s1686_s13 = smov [#allocation5]  }
   0x5   :  { %s38_s14 = sshll.u32 %s1686_s13, 4  ;;  %s39_s14 = int_to_ptr.vmem [resolvable:$true] %s38_s14 }
   0x6   :  { %s1524_s15 = scalar_lea.vmem %s39_s14, 128  ;;  %p1529_p1 = scmp.lt.s32.totalorder %s39_s14, %s39_s14 }
   0x7   :  { %p1525_p0 = scmp.ne.s32.totalorder %s39_s14, %s1524_s15  ;;  %p1530_p2 = scmp.lt.s32.totalorder %s1524_s15, %s1524_s15 }
   0x9   :  { %p1531_p3 = por %p1530_p2, %p1529_p1 }
   0xb   :  { %p1532_p4 = pnand %p1531_p3, %p1525_p0 }
   0xd   :  { %1535 = shalt.err (!%p1532_p4)
}
   0xe   :  { %41 = dma.hbm_to_vmem [thread:$0]  %s2093_s1, 128, %s39_s14, [#allocation6]  }
   0xf   :  { %s1687_s18 = smov [#allocation8]   ;;  %s1688_s20 = smov [#allocation11]  }
  0x10   :  { %s61_s19 = sshll.u32 %s1687_s18, 4  ;;  %s87_s21 = sshll.u32 %s1688_s20, 4  ;;  %s62_s19 = int_to_ptr.vmem [resolvable:$true] %s61_s19  ;;  %s88_s21 = int_to_ptr.vmem [resolvable:$true] %s87_s21 }
  0x11   :  { %s1544_s22 = scalar_lea.vmem %s62_s19, 512  ;;  %p1549_p6 = scmp.lt.s32.totalorder %s62_s19, %s62_s19 }
  0x12   :  { %p1545_p5 = scmp.ne.s32.totalorder %s62_s19, %s1544_s22  ;;  %p1550_p7 = scmp.lt.s32.totalorder %s1544_s22, %s1544_s22 }
  0x14   :  { %p1551_p8 = por %p1550_p7, %p1549_p6 }
  0x16   :  { %p1552_p9 = pnand %p1551_p8, %p1545_p5 }
  0x18   :  { %1555 = shalt.err (!%p1552_p9)
}
  0x19   :  { %s1689_s23 = smov 128   ;;  %s1690_s24 = smov 8  }
  0x1a   :  { %67 = dma.hbm_to_vmem [thread:$0]  %s2096_s4, 512, %s62_s19, [#allocation9], %s1689_s23, %s1689_s23, %s1690_s24  }
  0x1b   :  { %s1564_s1 = scalar_lea.vmem %s88_s21, 512  ;;  %p1569_p11 = scmp.lt.s32.totalorder %s88_s21, %s88_s21 }
  0x1c   :  { %p1565_p10 = scmp.ne.s32.totalorder %s88_s21, %s1564_s1  ;;  %p1570_p12 = scmp.lt.s32.totalorder %s1564_s1, %s1564_s1 }
  0x1e   :  { %p1571_p13 = por %p1570_p12, %p1569_p11 }
  0x20   :  { %p1572_p0 = pnand %p1571_p13, %p1565_p10 }
  0x22   :  { %1575 = shalt.err (!%p1572_p0)
}
  0x23   :  { %93 = dma.hbm_to_vmem [thread:$0]  %s2099_s7, 512, %s88_s21, [#allocation12], %s1689_s23, %s1689_s23, %s1690_s24  }
  0x24   :  { %s1691_s29 = smov [#allocation2]   ;;  %s1692_s11 = smov [#allocation7]  }
  0x25   :  { %s25_s30 = sshll.u32 %s1691_s29, 4  ;;  %s47_s4 = sshll.u32 %s1692_s11, 4  ;;  %s26_s30 = int_to_ptr.vmem [resolvable:$true] %s25_s30  ;;  %s48_s4 = int_to_ptr.vmem [resolvable:$true] %s47_s4 }
  0x26   :  { %s1584_s12 = scalar_lea.vmem %s26_s30, 1024  ;;  %p1589_p2 = scmp.lt.s32.totalorder %s26_s30, %s26_s30 }
  0x27   :  { %p1585_p1 = scmp.ne.s32.totalorder %s26_s30, %s1584_s12  ;;  %p1590_p3 = scmp.lt.s32.totalorder %s1584_s12, %s1584_s12 }
  0x29   :  { %p1591_p4 = por %p1590_p3, %p1589_p2 }
  0x2b   :  { %p1592_p5 = pnand %p1591_p4, %p1585_p1 }
  0x2d   :  { %1595 = shalt.err (!%p1592_p5)
}
  0x2e   :  { %31 = dma.hbm_to_vmem [thread:$0]  %s2092_s0, 1024, %s26_s30, [#allocation3], %s1689_s23, %s1689_s23, %s1690_s24  }
  0x2f   :  { %s1604_s7 = scalar_lea.vmem %s48_s4, 256  ;;  %p1609_p7 = scmp.lt.s32.totalorder %s48_s4, %s48_s4 }
  0x30   :  { %p1605_p6 = scmp.ne.s32.totalorder %s48_s4, %s1604_s7  ;;  %p1610_p8 = scmp.lt.s32.totalorder %s1604_s7, %s1604_s7 }
  0x32   :  { %p1611_p9 = por %p1610_p8, %p1609_p7 }
  0x34   :  { %p1612_p10 = pnand %p1611_p9, %p1605_p6 }
  0x36   :  { %1615 = shalt.err (!%p1612_p10)
}
  0x37   :  { %53 = dma.hbm_to_vmem [thread:$0]  %s2094_s2, 256, %s48_s4, [#allocation6], %s1689_s23, %s1689_s23, %s1690_s24  }
  0x38   :  { %s1693_s17 = smov [#allocation10]   ;;  %s1694_s19 = smov [#allocation13]  }
  0x39   :  { %s73_s18 = sshll.u32 %s1693_s17, 4  ;;  %s99_s0 = sshll.u32 %s1694_s19, 4  ;;  %s74_s18 = int_to_ptr.vmem [resolvable:$true] %s73_s18  ;;  %s100_s0 = int_to_ptr.vmem [resolvable:$true] %s99_s0 }
  0x3a   :  { %s1624_s20 = scalar_lea.vmem %s74_s18, 512  ;;  %p1629_p12 = scmp.lt.s32.totalorder %s74_s18, %s74_s18 }
  0x3b   :  { %p1625_p11 = scmp.ne.s32.totalorder %s74_s18, %s1624_s20  ;;  %p1630_p13 = scmp.lt.s32.totalorder %s1624_s20, %s1624_s20 }
  0x3d   :  { %p1631_p0 = por %p1630_p13, %p1629_p12 }
  0x3f   :  { %p1632_p1 = pnand %p1631_p0, %p1625_p11 }
  0x41   :  { %1635 = shalt.err (!%p1632_p1)
}
  0x42   :  { %79 = dma.hbm_to_vmem [thread:$0]  %s2097_s5, 512, %s74_s18, [#allocation9], %s1689_s23, %s1689_s23, %s1690_s24  }
  0x43   :  { %s1644_s2 = scalar_lea.vmem %s100_s0, 512  ;;  %p1649_p3 = scmp.lt.s32.totalorder %s100_s0, %s100_s0 }
  0x44   :  { %p1645_p2 = scmp.ne.s32.totalorder %s100_s0, %s1644_s2  ;;  %p1650_p4 = scmp.lt.s32.totalorder %s1644_s2, %s1644_s2 }
  0x46   :  { %p1651_p5 = por %p1650_p4, %p1649_p3 }
  0x48   :  { %p1652_p6 = pnand %p1651_p5, %p1645_p2 }
  0x4a   :  { %1655 = shalt.err (!%p1652_p6)
}
  0x4b   :  { %105 = dma.hbm_to_vmem [thread:$0]  %s2100_s8, 512, %s100_s0, [#allocation12], %s1689_s23, %s1689_s23, %s1690_s24  }
  0x4c   :  { %1676 = dma.done.wait [#allocation3], 1024  }
  0x4d   :  { %1677 = vsyncadd [#allocation3], 4294966272 }
  0x4e   :  { %1678 = dma.done.wait [#allocation6], 384  }
  0x4f   :  { %1679 = vsyncadd [#allocation6], 4294966912 }
  0x50   :  { %1680 = dma.done.wait [#allocation9], 1024  }
  0x51   :  { %1681 = vsyncadd [#allocation9], 4294966272 }
  0x52   :  { %1682 = dma.done.wait [#allocation12], 1024  }
  0x53   :  { %1683 = vsyncadd [#allocation12], 4294966272  ;;  %v130_v0 = vlaneseq  ;;  %vm216_vm0 = vcmask 130048   ;;  %v208_v2 = vld [vmem:[#allocation7 + $0x8] sm:$0xff]  ;;  %v207_v3 = vld [vmem:[#allocation7] sm:$0xff]  ;;  %vm194_vm1 = vcmask 64512  }
  0x54   :  { %v199_v4 = vld [vmem:[#allocation2] sm:$0xff]  ;;  %1425 = vmatprep.subr.mxu0 %v208_v2  ;;  %v200_v7 = vld [vmem:[#allocation2 + $0x8] sm:$0xff]  ;;  %v201_v9 = vld [vmem:[#allocation2 + $0x10] sm:$0xff]  ;;  %v1695_v35 = vmov 0.0   ;;  %vm1696_vm2 = vmmov 0   ;;  %vm402_vm5 = vcmask 261120  }
  0x55   :  { %v1793_v1 = vshrl.u32 %v130_v0, 7  ;;  %1429 = vmatprep.mubr.msk.f32.mxu0 %vm216_vm0, %v199_v4  ;;  %1426 = vmatpush3.msra.mxu0 %v208_v2  ;;  %v129_v10 = vld [vmem:[#allocation5] sm:$0xff]  ;;  %v202_v14 = vld [vmem:[#allocation2 + $0x18] sm:$0xff]  ;;  %v204_v20 = vld [vmem:[#allocation2 + $0x28] sm:$0xff] }
  0x56   :  { %1427 = vmatprep.subr.mxu0 %v207_v3  ;;  %v203_v17 = vld [vmem:[#allocation2 + $0x20] sm:$0xff]  ;;  %v205_v23 = vld [vmem:[#allocation2 + $0x30] sm:$0xff]  ;;  %v206_v26 = vld [vmem:[#allocation2 + $0x38] sm:$0xff]  ;;  %v195_v29 = vsel %vm194_vm1, %v129_v10, -inf }
  0x57   :  { %v1796_v5 = vsub.s32 0, %v1793_v1  ;;  %v146_v6 = vsub.s32 2, %v1793_v1  ;;  %v139_v8 = vsub.s32 1, %v1793_v1  ;;  %v153_v11 = vsub.s32 3, %v1793_v1  ;;  %1428 = vmatpush3.msra.mxu0 %v207_v3  ;;  %v488_v30 = vld [vmem:[#allocation8 + $0x18] sm:$0xff]  ;;  %v487_v31 = vld [vmem:[#allocation8 + $0x10] sm:$0xff] }
  0x58   :  { %1430 = vmatmul.mubr.msk.f32.vlgmr.msra.gmra.mxu0 %vm216_vm0, %v200_v7  ;;  %v160_v16 = vsub.s32 4, %v1793_v1  ;;  %v167_v19 = vsub.s32 5, %v1793_v1  ;;  %v174_v22 = vsub.s32 6, %v1793_v1  ;;  %v181_v25 = vsub.s32 7, %v1793_v1  ;;  %1441 = vmatprep.subr.mxu1 %v488_v30  ;;  %v486_v32 = vld [vmem:[#allocation8 + $0x8] sm:$0xff]  ;;  %v485_v33 = vld [vmem:[#allocation8] sm:$0xff] }
  0x59   :  { %v133_v12 = vrot.slane %v129_v10, %v1796_v5  ;;  %v147_v13 = vrot.slane %v129_v10, %v146_v6  ;;  %1432 = vmatprep.mubr.msk.f32.mxu0 %vm216_vm0, %v201_v9  ;;  %v140_v15 = vrot.slane %v129_v10, %v139_v8  ;;  %v154_v18 = vrot.slane %v129_v10, %v153_v11  ;;  %v628_v34 = vld [vmem:[#allocation10 + $0x18] sm:$0xff]  ;;  %v627_v36 = vld [vmem:[#allocation10 + $0x10] sm:$0xff]  ;;  %v626_v37 = vld [vmem:[#allocation10 + $0x8] sm:$0xff] }
  0x5a   :  { %v161_v21 = vrot.slane %v129_v10, %v160_v16  ;;  %v168_v24 = vrot.slane %v129_v10, %v167_v19  ;;  %v175_v27 = vrot.slane %v129_v10, %v174_v22  ;;  %v182_v28 = vrot.slane %v129_v10, %v181_v25  ;;  %1442 = vmatpush3.msra.mxu1 %v488_v30  ;;  %v625_v38 = vld [vmem:[#allocation10] sm:$0xff]  ;;  %v1830_v42 = vld [vmem:[%s2095_s3] ss:$0 sm:$0xff] }
  0x5b   :  { %135 = vbcast.lane.b32.xlu0 %v133_v12, 256  ;;  %149 = vbcast.lane.b32.xlu1 %v147_v13, 256 }
  0x5c   :  { %1433 = vmatmul.mubr.msk.f32.gmra.mxu0 %vm216_vm0, %v202_v14  ;;  %1443 = vmatprep.subr.mxu1 %v487_v31 }
  0x5d   :  { %1435 = vmatprep.mubr.msk.f32.mxu0 %vm216_vm0, %v203_v17  ;;  %1444 = vmatpush3.msra.mxu1 %v487_v31 }
  0x5e   :  { %1445 = vmatprep.subr.mxu1 %v486_v32  ;;  %1461 = vmatprep.subr.mxu0 %v1695_v35 }
  0x5f   :  { %142 = vbcast.lane.b32.xlu0 %v140_v15, 256  ;;  %156 = vbcast.lane.b32.xlu1 %v154_v18, 256 }
  0x60   :  { %1436 = vmatmul.mubr.msk.f32.gmra.mxu0 %vm216_vm0, %v204_v20  ;;  %1446 = vmatpush3.msra.mxu1 %v486_v32 }
  0x61   :  { %1438 = vmatprep.mubr.msk.f32.mxu0 %vm216_vm0, %v205_v23  ;;  %1447 = vmatprep.subr.mxu1 %v485_v33 }
  0x62   :  { %1448 = vmatpush3.msra.mxu1 %v485_v33  ;;  %1462 = vmatpush3.msra.mxu0 %v628_v34 }
  0x63   :  { %163 = vbcast.lane.b32.xlu0 %v161_v21, 256  ;;  %170 = vbcast.lane.b32.xlu1 %v168_v24, 256 }
  0x64   :  { %1439 = vmatmul.mubr.msk.f32.gmra.mxu0 %vm216_vm0, %v206_v26  ;;  %1463 = vmatprep.subr.mxu0 %v1695_v35 }
  0x65   :  { %1464 = vmatpush3.msra.mxu0 %v627_v36  ;;  %1469 = vmatprep.mubr.msk.f32.mxu0 %vm1696_vm2, %v1695_v35 }
  0x66   :  { %1465 = vmatprep.subr.mxu0 %v1695_v35 }
  0x67   :  { %177 = vbcast.lane.b32.xlu0 %v175_v27, 256  ;;  %184 = vbcast.lane.b32.xlu1 %v182_v28, 256 }
  0x68   :  { %1466 = vmatpush3.msra.mxu0 %v626_v37 }
  0x69   :  { %1467 = vmatprep.subr.mxu0 %v1695_v35 }
  0x6a   :  { %1468 = vmatpush3.msra.mxu0 %v625_v38 }
  0x6b   :  { %1492 = vmatprep.subr.mxu0 %v1695_v35 }
  0x86   :  { %196 = vmax.xlane.f32.xlu0 %v195_v29 }
  0xcd   :  { %v1821_v39 = vpop.permute.xlu0 %135  ;;  %v1823_v40 = vpop.permute.xlu1 %149 }
  0xce   :  { %vm186_vm7 = vcmp.gt.f32.partialorder %v1821_v39, 0.5  ;;  %vm188_vm8 = vcmp.gt.f32.partialorder %v1823_v40, 0.5 }
  0xd1   :  { %v1825_v41 = vpop.permute.xlu0 %142  ;;  %v1833_v45 = vpop.permute.xlu1 %156 }
  0xd2   :  { %vm187_vm4 = vcmp.gt.f32.partialorder %v1825_v41, 0.5  ;;  %vm189_vm9 = vcmp.gt.f32.partialorder %v1833_v45, 0.5 }
  0xd5   :  { %v1837_v49 = vpop.permute.xlu0 %163  ;;  %v1846_v59 = vpop.permute.xlu1 %170 }
  0xd6   :  { %vm190_vm12 = vcmp.gt.f32.partialorder %v1837_v49, 0.5  ;;  %vm191_vm13 = vcmp.gt.f32.partialorder %v1846_v59, 0.5 }
  0xd9   :  { %v1858_v4 = vpop.permute.xlu0 %177 }
  0xda   :  { %vm192_vm14 = vcmp.gt.f32.partialorder %v1858_v4, 0.5 }
 0x118   :  { %v1431_v43 = vpop.f32.mrf.mxu0 }
 0x119   :  { %v313_v44 = vadd.f32 %v1431_v43, %v1830_v42 }
 0x11a   :  { %v307_v46 = vpop.f32.mrf.mxu0 }
 0x11b   :  { %vm347_vm3 = vcmp.gt.f32.partialorder %v313_v44, 0.0  ;;  %v355_v47 = vmul.f32 0.01, %v313_v44  ;;  %v308_v48 = vadd.f32 %v1830_v42, %v307_v46 }
 0x11c   :  { %v1434_v50 = vpop.f32.mrf.mxu0 }
 0x11d   :  { %v354_v51 = vmul.f32 0.01, %v308_v48  ;;  %v323_v52 = vadd.f32 %v1434_v50, %v1830_v42  ;;  %vm346_vm6 = vcmp.gt.f32.partialorder %v308_v48, 0.0  ;;  %v363_v53 = vsel %vm347_vm3, %v313_v44, %v355_v47  ;;  %v1883_v44 = vpop.permute.xlu1 %184 }
 0x11e   :  { %v317_v54 = vpop.f32.mrf.mxu0  ;;  %v395_v55 = vsel %vm187_vm4, %v363_v53, -inf  ;;  %v387_v3 = vsel %vm187_vm4, %v363_v53, 0.0 }
 0x11f   :  { %v357_v56 = vmul.f32 0.01, %v323_v52  ;;  %v318_v57 = vadd.f32 %v1830_v42, %v317_v54  ;;  %v362_v58 = vsel %vm346_vm6, %v308_v48, %v354_v51  ;;  %vm349_vm10 = vcmp.gt.f32.partialorder %v323_v52, 0.0 }
 0x120   :  { %v1437_v60 = vpop.f32.mrf.mxu0  ;;  %v386_v61 = vsel %vm186_vm7, %v362_v58, 0.0  ;;  %v394_v62 = vsel %vm186_vm7, %v362_v58, -inf  ;;  %v410_v63 = vsel %vm402_vm5, %v395_v55, -inf  ;;  %vm2103_vm6 = vcmp.gt.f32.partialorder %v1883_v44, 0.5 }
 0x121   :  { %vm348_vm11 = vcmp.gt.f32.partialorder %v318_v57, 0.0  ;;  %v356_v0 = vmul.f32 0.01, %v318_v57  ;;  %v403_v2 = vsel %vm402_vm5, %v394_v62, -inf  ;;  %1449 = vmatprep.mubr.msk.f32.mxu1 %vm402_vm5, %v386_v61  ;;  %v411_v8 = vrot.slane %v410_v63, 4 }
 0x122   :  { %v404_v6 = vrot.slane %v403_v2, 4  ;;  %v327_v7 = vpop.f32.mrf.mxu0  ;;  %1450 = vmatmul.mubr.msk.f32.vlgmr.msra.gmra.mxu1 %vm402_vm5, %v387_v3  ;;  %v333_v9 = vadd.f32 %v1437_v60, %v1830_v42  ;;  %v365_v12 = vsel %vm349_vm10, %v323_v52, %v357_v56  ;;  %vm2111_vm10 = vcmask 1041409  }
 0x123   :  { %v328_v10 = vadd.f32 %v1830_v42, %v327_v7  ;;  %v364_v11 = vsel %vm348_vm11, %v318_v57, %v356_v0  ;;  %v412_v14 = vmax.f32 %v410_v63, %v411_v8  ;;  %v389_v25 = vsel %vm189_vm9, %v365_v12, 0.0 }
 0x124   :  { %v405_v13 = vmax.f32 %v403_v2, %v404_v6  ;;  %v1440_v15 = vpop.f32.mrf.mxu0  ;;  %v388_v16 = vsel %vm188_vm8, %v364_v11, 0.0  ;;  %v396_v17 = vsel %vm188_vm8, %v364_v11, -inf  ;;  %vm351_vm0 = vcmp.gt.f32.partialorder %v333_v9, 0.0 }
 0x125   :  { %vm350_vm15 = vcmp.gt.f32.partialorder %v328_v10, 0.0  ;;  %v358_v18 = vmul.f32 0.01, %v328_v10  ;;  %v343_v19 = vadd.f32 %v1440_v15, %v1830_v42  ;;  %v417_v20 = vsel %vm402_vm5, %v396_v17, -inf  ;;  %1452 = vmatprep.mubr.msk.f32.mxu1 %vm402_vm5, %v388_v16 }
 0x126   :  { %v406_v21 = vrot.slane %v405_v13, 2  ;;  %v413_v22 = vrot.slane %v412_v14, 2  ;;  %v418_v23 = vrot.slane %v417_v20, 4  ;;  %v337_v24 = vpop.f32.mrf.mxu0  ;;  %v359_v26 = vmul.f32 0.01, %v333_v9  ;;  %1453 = vmatmul.mubr.msk.f32.gmra.mxu1 %vm402_vm5, %v389_v25 }
 0x127   :  { %v338_v27 = vadd.f32 %v1830_v42, %v337_v24  ;;  %v397_v28 = vsel %vm189_vm9, %v365_v12, -inf  ;;  %v366_v36 = vsel %vm350_vm15, %v328_v10, %v358_v18  ;;  %vm353_vm3 = vcmp.gt.f32.partialorder %v343_v19, 0.0 }
 0x128   :  { %v407_v29 = vmax.f32 %v405_v13, %v406_v21  ;;  %v414_v30 = vmax.f32 %v412_v14, %v413_v22  ;;  %v419_v31 = vmax.f32 %v417_v20, %v418_v23  ;;  %v424_v32 = vsel %vm402_vm5, %v397_v28, -inf }
 0x129   :  { %vm352_vm1 = vcmp.gt.f32.partialorder %v338_v27, 0.0  ;;  %v360_v33 = vmul.f32 0.01, %v338_v27  ;;  %v425_v34 = vrot.slane %v424_v32, 4  ;;  %v361_v37 = vmul.f32 0.01, %v343_v19 }
 0x12a   :  { %v420_v38 = vrot.slane %v419_v31, 2  ;;  %v390_v42 = vsel %vm190_vm12, %v366_v36, 0.0  ;;  %v398_v46 = vsel %vm190_vm12, %v366_v36, -inf  ;;  %v367_v47 = vsel %vm351_vm0, %v333_v9, %v359_v26 }
 0x12b   :  { %v426_v43 = vmax.f32 %v424_v32, %v425_v34  ;;  %1455 = vmatprep.mubr.msk.f32.mxu1 %vm402_vm5, %v390_v42  ;;  %v368_v48 = vsel %vm352_vm1, %v338_v27, %v360_v33  ;;  %v408_v50 = vrot.slane %v407_v29, 1  ;;  %v415_v51 = vrot.slane %v414_v30, 1  ;;  %v1914_v42 = vpop.xlane.xlu0 %196 }
 0x12c   :  { %v421_v52 = vmax.f32 %v419_v31, %v420_v38  ;;  %v431_v53 = vsel %vm402_vm5, %v398_v46, -inf  ;;  %v391_v56 = vsel %vm191_vm13, %v367_v47, 0.0  ;;  %v399_v57 = vsel %vm191_vm13, %v367_v47, -inf }
 0x12d   :  { %v427_v54 = vrot.slane %v426_v43, 2  ;;  %v432_v55 = vrot.slane %v431_v53, 4  ;;  %v438_v60 = vsel %vm402_vm5, %v399_v57, -inf  ;;  %1456 = vmatmul.mubr.msk.f32.gmra.mxu1 %vm402_vm5, %v391_v56  ;;  %v392_v61 = vsel %vm192_vm14, %v368_v48, 0.0  ;;  %v1056_v56 = vld [vmem:[#allocation13 + $0x18] sm:$0xff]  ;;  %v1055_v57 = vld [vmem:[#allocation13 + $0x10] sm:$0xff] }
 0x12e   :  { %v422_v58 = vrot.slane %v421_v52, 1  ;;  %v439_v0 = vrot.slane %v438_v60, 4  ;;  %v400_v2 = vsel %vm192_vm14, %v368_v48, -inf  ;;  %1458 = vmatprep.mubr.msk.f32.mxu1 %vm402_vm5, %v392_v61  ;;  %v409_v3 = vmax.f32 %v407_v29, %v408_v50 }
 0x12f   :  { %v428_v62 = vmax.f32 %v426_v43, %v427_v54  ;;  %v433_v63 = vmax.f32 %v431_v53, %v432_v55  ;;  %v445_v6 = vsel %vm402_vm5, %v400_v2, -inf  ;;  %v369_v7 = vsel %vm353_vm3, %v343_v19, %v361_v37  ;;  %v915_v53 = vld [vmem:[#allocation11 + $0x10] sm:$0xff]  ;;  %v914_v54 = vld [vmem:[#allocation11 + $0x8] sm:$0xff]  ;;  %v913_v55 = vld [vmem:[#allocation11] sm:$0xff] }
 0x130   :  { %v416_v8 = vmax.f32 %v414_v30, %v415_v51  ;;  %v440_v10 = vmax.f32 %v438_v60, %v439_v0  ;;  %v446_v11 = vrot.slane %v445_v6, 4  ;;  %v423_v12 = vmax.f32 %v421_v52, %v422_v58  ;;  %v916_v52 = vld [vmem:[#allocation11 + $0x18] sm:$0xff]  ;;  %v1054_v58 = vld [vmem:[#allocation13 + $0x8] sm:$0xff]  ;;  %v1053_v60 = vld [vmem:[#allocation13] sm:$0xff] }
 0x131   :  { %v434_v9 = vrot.slane %v433_v63, 2  ;;  %v429_v13 = vrot.slane %v428_v62, 1  ;;  %v393_v14 = vsel %vm2103_vm6, %v369_v7, 0.0  ;;  %v401_v15 = vsel %vm2103_vm6, %v369_v7, -inf  ;;  %1472 = vmatprep.subr.mxu1 %v916_v52 }
 0x132   :  { %v441_v17 = vrot.slane %v440_v10, 2  ;;  %v447_v18 = vmax.f32 %v445_v6, %v446_v11  ;;  %1459 = vmatmul.mubr.msk.f32.gmra.mxu1 %vm402_vm5, %v393_v14  ;;  %vm2104_vm11 = vcmask 1042434   ;;  %v470_v19 = vsel %vm2111_vm10, %v416_v8, %v409_v3  ;;  %v1934_v11 = vld [vmem:[%s2098_s6] ss:$0 sm:$0xff] }
 0x133   :  { %v435_v16 = vmax.f32 %v433_v63, %v434_v9  ;;  %v452_v20 = vsel %vm402_vm5, %v401_v15, -inf  ;;  %v430_v25 = vmax.f32 %v428_v62, %v429_v13  ;;  %v472_v26 = vsel %vm2104_vm11, %v423_v12, %v470_v19  ;;  %1473 = vmatpush3.msra.mxu1 %v916_v52 }
 0x134   :  { %v442_v22 = vmax.f32 %v440_v10, %v441_v17  ;;  %v448_v23 = vrot.slane %v447_v18, 2  ;;  %v453_v24 = vrot.slane %v452_v20, 4  ;;  %vm2110_vm15 = vcmask 1043459   ;;  %1474 = vmatprep.subr.mxu1 %v915_v53 }
 0x135   :  { %v436_v21 = vrot.slane %v435_v16, 1  ;;  %vm2109_vm0 = vcmask 1044484   ;;  %v474_v33 = vsel %vm2110_vm15, %v430_v25, %v472_v26  ;;  %vm2108_vm1 = vcmask 1045509   ;;  %1475 = vmatpush3.msra.mxu1 %v915_v53 }
 0x136   :  { %v443_v28 = vrot.slane %v442_v22, 1  ;;  %v449_v29 = vmax.f32 %v447_v18, %v448_v23  ;;  %v454_v30 = vmax.f32 %v452_v20, %v453_v24  ;;  %vm2107_vm3 = vcmask 1046534   ;;  %1476 = vmatprep.subr.mxu1 %v914_v54 }
 0x137   :  { %v437_v27 = vmax.f32 %v435_v16, %v436_v21  ;;  %vm2106_vm6 = vcmask 1047559   ;;  %vm2105_vm11 = vcmp.gt.f32.partialorder %v1914_v42, 0.0  ;;  %1477 = vmatpush3.msra.mxu1 %v914_v54  ;;  %v1697_v0 = vmov 1966171168  }
 0x138   :  { %v450_v31 = vrot.slane %v449_v29, 1  ;;  %v455_v32 = vrot.slane %v454_v30, 2  ;;  %v444_v36 = vmax.f32 %v442_v22, %v443_v28  ;;  %1478 = vmatprep.subr.mxu1 %v913_v55  ;;  %v705_v2 = vunpack.c.l.s4 %v1697_v0 }
 0x139   :  { %v476_v34 = vsel %vm2109_vm0, %v437_v27, %v474_v33  ;;  %1479 = vmatpush3.msra.mxu1 %v913_v55 }
 0x13a   :  { %v451_v37 = vmax.f32 %v449_v29, %v450_v31  ;;  %v456_v38 = vmax.f32 %v454_v30, %v455_v32  ;;  %v478_v46 = vsel %vm2108_vm1, %v444_v36, %v476_v34  ;;  %v706_v6 = vunpack.c.0.s8 %v705_v2 }
 0x13c   :  { %v457_v43 = vrot.slane %v456_v38, 1  ;;  %v480_v47 = vsel %vm2107_vm3, %v451_v37, %v478_v46  ;;  %v1929_v8 = vsub.s32 %v706_v6, %v1793_v1 }
 0x13e   :  { %v458_v48 = vmax.f32 %v456_v38, %v457_v43 }
 0x140   :  { %v482_v50 = vsel %vm2106_vm6, %v458_v48, %v480_v47 }
 0x141   :  { %v484_v51 = vsel %vm2105_vm11, %v482_v50, 0.0 }
 0x142   :  { %1470 = vmatmul.mubr.msk.f32.vlgmr.msra.gmra.mxu0 %vm402_vm5, %v484_v51 }
 0x143   :  { %1500 = vmatprep.mubr.msk.f32.mxu0 %vm1696_vm2, %v1695_v35  ;;  %1493 = vmatpush3.msra.mxu0 %v1056_v56 }
 0x144   :  { %1494 = vmatprep.subr.mxu0 %v1695_v35 }
 0x145   :  { %1495 = vmatpush3.msra.mxu0 %v1055_v57 }
 0x146   :  { %1496 = vmatprep.subr.mxu0 %v1695_v35 }
 0x147   :  { %1497 = vmatpush3.msra.mxu0 %v1054_v58 }
 0x148   :  { %1498 = vmatprep.subr.mxu0 %v1695_v35 }
 0x149   :  { %1499 = vmatpush3.msra.mxu0 %v1053_v60 }
 0x1e2   :  { %v1451_v61 = vpop.f32.mrf.mxu1 }
 0x1e3   :  { %v592_v1 = vadd.f32 %v1451_v61, %v1934_v11 }
 0x1e4   :  { %v586_v62 = vpop.f32.mrf.mxu1 }
 0x1e5   :  { %v587_v18 = vadd.f32 %v1934_v11, %v586_v62 }
 0x1e6   :  { %v1454_v63 = vpop.f32.mrf.mxu1 }
 0x1e7   :  { %v602_v23 = vadd.f32 %v1454_v63, %v1934_v11 }
 0x1e8   :  { %v596_v3 = vpop.f32.mrf.mxu1 }
 0x1e9   :  { %v597_v24 = vadd.f32 %v1934_v11, %v596_v3 }
 0x1ed   :  { %v1457_v7 = vpop.f32.mrf.mxu1 }
 0x1ee   :  { %v612_v25 = vadd.f32 %v1457_v7, %v1934_v11 }
 0x1ef   :  { %v606_v9 = vpop.f32.mrf.mxu1 }
 0x1f0   :  { %v607_v32 = vadd.f32 %v1934_v11, %v606_v9 }
 0x1f2   :  { %v1937_v13 = vpop.f32.mrf.mxu1 }
 0x1f4   :  { %v616_v26 = vpop.f32.mrf.mxu1 }
 0x1f5   :  { %v617_v37 = vadd.f32 %v1934_v11, %v616_v26 }
 0x202   :  { %v698_v10 = vpop.f32.mrf.mxu0 }
 0x203   :  { %v703_v35 = vcombine.high %v698_v10, %v698_v10  ;;  %v710_v12 = vrot.slane %v698_v10, %v1929_v8 }
 0x204   :  { %v1471_v14 = vpop.f32.mrf.mxu0 }
 0x205   :  { %v717_v15 = vrot.slane %v703_v35, %v1929_v8  ;;  %v718_v16 = vcombine.high %v710_v12, %v710_v12  ;;  %v726_v17 = vrot.slane %v710_v12, %v1929_v8 }
 0x207   :  { %v719_v19 = vcombine.high %v717_v15, %v717_v15  ;;  %v733_v20 = vrot.slane %v717_v15, %v1929_v8  ;;  %v740_v21 = vrot.slane %v718_v16, %v1929_v8  ;;  %v748_v22 = vcombine.high %v726_v17, %v726_v17 }
 0x208   :  { %v755_v27 = vrot.slane %v726_v17, %v1796_v5 }
 0x209   :  { %v1950_v28 = vrot.slane %v719_v19, %v1929_v8  ;;  %v749_v29 = vcombine.high %v733_v20, %v733_v20  ;;  %v750_v30 = vcombine.high %v740_v21, %v740_v21  ;;  %v759_v31 = vrot.slane %v740_v21, %v1796_v5 }
 0x20a   :  { %v763_v33 = vrot.slane %v748_v22, %v1796_v5  ;;  %v771_v34 = vrot.slane %v733_v20, %v1796_v5  ;;  %v792_v36 = vadd.f32 %v755_v27, %v587_v18 }
 0x20b   :  { %v767_v38 = vrot.slane %v750_v30, %v1796_v5  ;;  %v775_v43 = vrot.slane %v1950_v28, %v1796_v5  ;;  %v779_v46 = vrot.slane %v749_v29, %v1796_v5  ;;  %v793_v47 = vadd.f32 %v759_v31, %v592_v1 }
 0x20c   :  { %vm800_vm2 = vcmp.gt.f32.partialorder %v792_v36, 0.0  ;;  %v808_v48 = vmul.f32 0.01, %v792_v36  ;;  %v794_v50 = vadd.f32 %v763_v33, %v597_v24  ;;  %v796_v52 = vadd.f32 %v771_v34, %v607_v32 }
 0x20d   :  { %v795_v51 = vadd.f32 %v767_v38, %v602_v23  ;;  %v797_v53 = vadd.f32 %v775_v43, %v612_v25  ;;  %v1961_v54 = vadd.f32 %v779_v46, %v617_v37  ;;  %vm801_vm11 = vcmp.gt.f32.partialorder %v793_v47, 0.0 }
 0x20e   :  { %v816_v55 = vsel %vm800_vm2, %v792_v36, %v808_v48  ;;  %v809_v56 = vmul.f32 0.01, %v793_v47  ;;  %vm802_vm6 = vcmp.gt.f32.partialorder %v794_v50, 0.0  ;;  %v810_v60 = vmul.f32 0.01, %v794_v50 }
 0x20f   :  { %v824_v57 = vsel %vm186_vm7, %v816_v55, 0.0  ;;  %v832_v58 = vsel %vm186_vm7, %v816_v55, -inf  ;;  %vm803_vm3 = vcmp.gt.f32.partialorder %v795_v51, 0.0  ;;  %v811_v63 = vmul.f32 0.01, %v795_v51 }
 0x210   :  { %v840_v61 = vsel %vm402_vm5, %v832_v58, -inf  ;;  %1480 = vmatprep.mubr.msk.f32.mxu1 %vm402_vm5, %v824_v57  ;;  %v817_v62 = vsel %vm801_vm11, %v793_v47, %v809_v56  ;;  %vm804_vm1 = vcmp.gt.f32.partialorder %v796_v52, 0.0  ;;  %v818_v6 = vsel %vm802_vm6, %v794_v50, %v810_v60 }
 0x211   :  { %v841_v0 = vrot.slane %v840_v61, 4  ;;  %v825_v2 = vsel %vm187_vm4, %v817_v62, 0.0  ;;  %v833_v3 = vsel %vm187_vm4, %v817_v62, -inf  ;;  %v826_v9 = vsel %vm188_vm8, %v818_v6, 0.0 }
 0x212   :  { %v847_v7 = vsel %vm402_vm5, %v833_v3, -inf  ;;  %1481 = vmatmul.mubr.msk.f32.vlgmr.msra.gmra.mxu1 %vm402_vm5, %v825_v2  ;;  %v834_v10 = vsel %vm188_vm8, %v818_v6, -inf  ;;  %v819_v35 = vsel %vm803_vm3, %v795_v51, %v811_v63  ;;  %v812_v18 = vmul.f32 0.01, %v796_v52 }
 0x213   :  { %v842_v12 = vmax.f32 %v840_v61, %v841_v0  ;;  %v848_v14 = vrot.slane %v847_v7, 4  ;;  %v854_v15 = vsel %vm402_vm5, %v834_v10, -inf  ;;  %1483 = vmatprep.mubr.msk.f32.mxu1 %vm402_vm5, %v826_v9  ;;  %v827_v16 = vsel %vm189_vm9, %v819_v35, 0.0 }
 0x214   :  { %v855_v17 = vrot.slane %v854_v15, 4  ;;  %v835_v1 = vsel %vm189_vm9, %v819_v35, -inf  ;;  %vm805_vm6 = vcmp.gt.f32.partialorder %v797_v53, 0.0  ;;  %v813_v22 = vmul.f32 0.01, %v797_v53 }
 0x215   :  { %v843_v19 = vrot.slane %v842_v12, 2  ;;  %v849_v20 = vmax.f32 %v847_v7, %v848_v14  ;;  %v861_v21 = vsel %vm402_vm5, %v835_v1, -inf  ;;  %v820_v25 = vsel %vm804_vm1, %v796_v52, %v812_v18 }
 0x216   :  { %v856_v23 = vmax.f32 %v854_v15, %v855_v17  ;;  %v862_v24 = vrot.slane %v861_v21, 4  ;;  %1484 = vmatmul.mubr.msk.f32.gmra.mxu1 %vm402_vm5, %v827_v16  ;;  %v828_v29 = vsel %vm190_vm12, %v820_v25, 0.0  ;;  %v836_v30 = vsel %vm190_vm12, %v820_v25, -inf }
 0x217   :  { %v844_v26 = vmax.f32 %v842_v12, %v843_v19  ;;  %v850_v27 = vrot.slane %v849_v20, 2  ;;  %v868_v33 = vsel %vm402_vm5, %v836_v30, -inf  ;;  %1486 = vmatprep.mubr.msk.f32.mxu1 %vm402_vm5, %v828_v29  ;;  %v821_v34 = vsel %vm805_vm6, %v797_v53, %v813_v22 }
 0x218   :  { %v857_v31 = vrot.slane %v856_v23, 2  ;;  %v863_v32 = vmax.f32 %v861_v21, %v862_v24  ;;  %v869_v37 = vrot.slane %v868_v33, 4  ;;  %v829_v38 = vsel %vm191_vm13, %v821_v34, 0.0 }
 0x219   :  { %v851_v36 = vmax.f32 %v849_v20, %v850_v27  ;;  %vm806_vm11 = vcmp.gt.f32.partialorder %v1961_v54, 0.0  ;;  %v837_v47 = vsel %vm191_vm13, %v821_v34, -inf  ;;  %v814_v48 = vmul.f32 0.01, %v1961_v54 }
 0x21a   :  { %v858_v43 = vmax.f32 %v856_v23, %v857_v31  ;;  %v864_v46 = vrot.slane %v863_v32, 2  ;;  %1487 = vmatmul.mubr.msk.f32.gmra.mxu1 %vm402_vm5, %v829_v38  ;;  %v751_v50 = vcombine.high %v1950_v28, %v1950_v28  ;;  %v870_v52 = vmax.f32 %v868_v33, %v869_v37 }
 0x21b   :  { %v852_v51 = vrot.slane %v851_v36, 1  ;;  %v875_v53 = vsel %vm402_vm5, %v837_v47, -inf  ;;  %v845_v55 = vrot.slane %v844_v26, 1  ;;  %v822_v58 = vsel %vm806_vm11, %v1961_v54, %v814_v48 }
 0x21c   :  { %v865_v56 = vmax.f32 %v863_v32, %v864_v46  ;;  %v876_v57 = vrot.slane %v875_v53, 4  ;;  %v859_v60 = vrot.slane %v858_v43, 1  ;;  %v871_v61 = vrot.slane %v870_v52, 2 }
 0x21d   :  { %v830_v62 = vsel %vm192_vm14, %v822_v58, 0.0  ;;  %v838_v63 = vsel %vm192_vm14, %v822_v58, -inf  ;;  %v853_v0 = vmax.f32 %v851_v36, %v852_v51  ;;  %v622_v3 = vadd.f32 %v1937_v13, %v1934_v11 }
 0x21e   :  { %v877_v2 = vmax.f32 %v875_v53, %v876_v57  ;;  %v882_v28 = vsel %vm402_vm5, %v838_v63, -inf  ;;  %1489 = vmatprep.mubr.msk.f32.mxu1 %vm402_vm5, %v830_v62  ;;  %v783_v54 = vrot.slane %v751_v50, %v1796_v5  ;;  %v846_v7 = vmax.f32 %v844_v26, %v845_v55 }
 0x21f   :  { %v883_v6 = vrot.slane %v882_v28, 4  ;;  %v866_v9 = vrot.slane %v865_v56, 1  ;;  %v860_v35 = vmax.f32 %v858_v43, %v859_v60  ;;  %v872_v12 = vmax.f32 %v870_v52, %v871_v61  ;;  %v1371_v60 = vld [vmem:[%s2101_s9] ss:$0 sm:$0xff]  ;;  %s1698_s9 = smov [#allocation14]  }
 0x220   :  { %v878_v10 = vrot.slane %v877_v2, 2  ;;  %v799_v15 = vadd.f32 %v783_v54, %v622_v3  ;;  %v904_v16 = vsel %vm2111_vm10, %v853_v0, %v846_v7  ;;  %vm2112_vm3 = vcmask 1042434   ;;  %s1340_s1 = sshll.u32 %s1698_s9, 4  ;;  %s1341_s1 = int_to_ptr.vmem [resolvable:$true] %s1340_s1 }
 0x221   :  { %v884_v14 = vmax.f32 %v882_v28, %v883_v6  ;;  %v867_v18 = vmax.f32 %v865_v56, %v866_v9  ;;  %v905_v20 = vsel %vm2112_vm3, %v860_v35, %v904_v16  ;;  %v873_v11 = vrot.slane %v872_v12, 1  ;;  %s1656_s27 = scalar_lea.vmem %s1341_s1, 128  ;;  %p1661_p8 = scmp.lt.s32.totalorder %s1341_s1, %s1341_s1 }
 0x222   :  { %vm807_vm1 = vcmp.gt.f32.partialorder %v799_v15, 0.0  ;;  %v815_v1 = vmul.f32 0.01, %v799_v15  ;;  %v879_v19 = vmax.f32 %v877_v2, %v878_v10  ;;  %vm2113_vm2 = vcmp.gt.f32.partialorder %v1883_v44, 0.5  ;;  %p1657_p7 = scmp.ne.s32.totalorder %s1341_s1, %s1656_s27  ;;  %p1662_p9 = scmp.lt.s32.totalorder %s1656_s27, %s1656_s27 }
 0x223   :  { %v885_v17 = vrot.slane %v884_v14, 2  ;;  %vm2114_vm6 = vmmov %vm2113_vm2  ;;  %v906_v27 = vsel %vm2110_vm15, %v867_v18, %v905_v20  ;;  %v874_v29 = vmax.f32 %v872_v12, %v873_v11  ;;  %vm2115_vm11 = vcmask 1045509  }
 0x224   :  { %v823_v13 = vsel %vm807_vm1, %v799_v15, %v815_v1  ;;  %v880_v25 = vrot.slane %v879_v19, 1  ;;  %vm2116_vm1 = vcmask 1046534   ;;  %vm2117_vm3 = vcmask 1047559   ;;  %p1663_p10 = por %p1662_p9, %p1661_p8 }
 0x225   :  { %v831_v21 = vsel %vm2113_vm2, %v823_v13, 0.0  ;;  %v839_v22 = vsel %vm2114_vm6, %v823_v13, -inf  ;;  %v886_v23 = vmax.f32 %v884_v14, %v885_v17  ;;  %v907_v32 = vsel %vm2109_vm0, %v874_v29, %v906_v27 }
 0x226   :  { %v889_v24 = vsel %vm402_vm5, %v839_v22, -inf  ;;  %1490 = vmatmul.mubr.msk.f32.gmra.mxu1 %vm402_vm5, %v831_v21  ;;  %v881_v33 = vmax.f32 %v879_v19, %v880_v25  ;;  %vm2118_vm2 = vcmp.gt.f32.partialorder %v1914_v42, 0.0  ;;  %p1664_p11 = pnand %p1663_p10, %p1657_p7 }
 0x227   :  { %v890_v26 = vrot.slane %v889_v24, 4  ;;  %v887_v31 = vrot.slane %v886_v23, 1 }
 0x228   :  { %v908_v37 = vsel %vm2115_vm11, %v881_v33, %v907_v32 }
 0x229   :  { %v891_v30 = vmax.f32 %v889_v24, %v890_v26  ;;  %v888_v38 = vmax.f32 %v886_v23, %v887_v31 }
 0x22b   :  { %v892_v34 = vrot.slane %v891_v30, 2  ;;  %v909_v46 = vsel %vm2116_vm1, %v888_v38, %v908_v37 }
 0x22d   :  { %v893_v36 = vmax.f32 %v891_v30, %v892_v34 }
 0x22f   :  { %v894_v43 = vrot.slane %v893_v36, 1 }
 0x231   :  { %v895_v47 = vmax.f32 %v893_v36, %v894_v43 }
 0x233   :  { %v910_v48 = vsel %vm2117_vm3, %v895_v47, %v909_v46 }
 0x234   :  { %v912_v50 = vsel %vm2118_vm2, %v910_v48, 0.0 }
 0x235   :  { %1501 = vmatmul.mubr.msk.f32.vlgmr.msra.gmra.mxu0 %vm402_vm5, %v912_v50 }
 0x2d2   :  { %v1482_v51 = vpop.f32.mrf.mxu1 }
 0x2d3   :  { %v1020_v6 = vadd.f32 %v1482_v51, %v1371_v60 }
 0x2d4   :  { %v1014_v52 = vpop.f32.mrf.mxu1 }
 0x2d5   :  { %v1015_v54 = vadd.f32 %v1371_v60, %v1014_v52 }
 0x2d6   :  { %v1485_v53 = vpop.f32.mrf.mxu1 }
 0x2d7   :  { %v1030_v7 = vadd.f32 %v1485_v53, %v1371_v60 }
 0x2d8   :  { %v1024_v55 = vpop.f32.mrf.mxu1 }
 0x2d9   :  { %v1025_v9 = vadd.f32 %v1371_v60, %v1024_v55 }
 0x2da   :  { %v1488_v56 = vpop.f32.mrf.mxu1 }
 0x2db   :  { %v1040_v16 = vadd.f32 %v1488_v56, %v1371_v60 }
 0x2dc   :  { %v1034_v57 = vpop.f32.mrf.mxu1 }
 0x2dd   :  { %v1035_v17 = vadd.f32 %v1371_v60, %v1034_v57 }
 0x2e6   :  { %v1491_v61 = vpop.f32.mrf.mxu1 }
 0x2e7   :  { %v1050_v1 = vadd.f32 %v1491_v61, %v1371_v60 }
 0x2e8   :  { %v1044_v10 = vpop.f32.mrf.mxu1 }
 0x2e9   :  { %v1045_v21 = vadd.f32 %v1371_v60, %v1044_v10 }
 0x2f5   :  { %v1126_v58 = vpop.f32.mrf.mxu0 }
 0x2f6   :  { %v1131_v62 = vcombine.high %v1126_v58, %v1126_v58  ;;  %v1138_v63 = vrot.slane %v1126_v58, %v1929_v8 }
 0x2f7   :  { %v1502_v0 = vpop.f32.mrf.mxu0 }
 0x2f8   :  { %v1145_v2 = vrot.slane %v1131_v62, %v1929_v8  ;;  %v1146_v28 = vcombine.high %v1138_v63, %v1138_v63  ;;  %v1154_v3 = vrot.slane %v1138_v63, %v1929_v8 }
 0x2fa   :  { %v1147_v35 = vcombine.high %v1145_v2, %v1145_v2  ;;  %v1161_v12 = vrot.slane %v1145_v2, %v1929_v8  ;;  %v1168_v14 = vrot.slane %v1146_v28, %v1929_v8  ;;  %v1176_v15 = vcombine.high %v1154_v3, %v1154_v3 }
 0x2fb   :  { %v1183_v18 = vrot.slane %v1154_v3, %v1796_v5 }
 0x2fc   :  { %v1175_v19 = vrot.slane %v1147_v35, %v1929_v8  ;;  %v1177_v20 = vcombine.high %v1161_v12, %v1161_v12  ;;  %v1178_v11 = vcombine.high %v1168_v14, %v1168_v14  ;;  %v1187_v13 = vrot.slane %v1168_v14, %v1796_v5 }
 0x2fd   :  { %v1191_v22 = vrot.slane %v1176_v15, %v1796_v5  ;;  %v1199_v23 = vrot.slane %v1161_v12, %v1796_v5  ;;  %v1220_v24 = vadd.f32 %v1183_v18, %v1015_v54 }
 0x2fe   :  { %v1179_v25 = vcombine.high %v1175_v19, %v1175_v19  ;;  %v1195_v26 = vrot.slane %v1178_v11, %v1796_v5  ;;  %v1203_v27 = vrot.slane %v1175_v19, %v1796_v5  ;;  %v1207_v29 = vrot.slane %v1177_v20, %v1796_v5 }
 0x2ff   :  { %v1221_v30 = vadd.f32 %v1187_v13, %v1020_v6  ;;  %v1222_v31 = vadd.f32 %v1191_v22, %v1025_v9  ;;  %v1224_v8 = vadd.f32 %v1199_v23, %v1035_v17  ;;  %vm1228_vm6 = vcmp.gt.f32.partialorder %v1220_v24, 0.0 }
 0x300   :  { %v1211_v32 = vrot.slane %v1179_v25, %v1796_v5  ;;  %v1223_v33 = vadd.f32 %v1195_v26, %v1030_v7  ;;  %v1225_v34 = vadd.f32 %v1203_v27, %v1040_v16  ;;  %v1226_v36 = vadd.f32 %v1207_v29, %v1045_v21 }
 0x301   :  { %vm1229_vm11 = vcmp.gt.f32.partialorder %v1221_v30, 0.0  ;;  %vm1230_vm1 = vcmp.gt.f32.partialorder %v1222_v31, 0.0  ;;  %vm1232_vm3 = vcmp.gt.f32.partialorder %v1224_v8, 0.0  ;;  %v1236_v37 = vmul.f32 0.01, %v1220_v24 }
 0x302   :  { %v1227_v38 = vadd.f32 %v1211_v32, %v1050_v1  ;;  %vm1231_vm2 = vcmp.gt.f32.partialorder %v1223_v33, 0.0  ;;  %vm1233_vm0 = vcmp.gt.f32.partialorder %v1225_v34, 0.0  ;;  %vm1234_vm15 = vcmp.gt.f32.partialorder %v1226_v36, 0.0 }
 0x303   :  { %v1237_v43 = vmul.f32 0.01, %v1221_v30  ;;  %v1238_v46 = vmul.f32 0.01, %v1222_v31  ;;  %v1239_v47 = vmul.f32 0.01, %v1223_v33  ;;  %v1244_v48 = vsel %vm1228_vm6, %v1220_v24, %v1236_v37 }
 0x304   :  { %vm1235_vm10 = vcmp.gt.f32.partialorder %v1227_v38, 0.0  ;;  %v1240_v50 = vmul.f32 0.01, %v1224_v8  ;;  %v1241_v51 = vmul.f32 0.01, %v1225_v34  ;;  %v1252_v5 = vsel %vm186_vm7, %v1244_v48, -inf }
 0x305   :  { %v1242_v52 = vmul.f32 0.01, %v1226_v36  ;;  %v1243_v53 = vmul.f32 0.01, %v1227_v38  ;;  %v1245_v55 = vsel %vm1229_vm11, %v1221_v30, %v1237_v43  ;;  %v1246_v56 = vsel %vm1230_vm1, %v1222_v31, %v1238_v46 }
 0x306   :  { %v1247_v57 = vsel %vm1231_vm2, %v1223_v33, %v1239_v47  ;;  %v1248_v58 = vsel %vm1232_vm3, %v1224_v8, %v1240_v50  ;;  %v1249_v60 = vsel %vm1233_vm0, %v1225_v34, %v1241_v51  ;;  %v1253_v61 = vsel %vm187_vm4, %v1245_v55, -inf }
 0x307   :  { %v1250_v62 = vsel %vm1234_vm15, %v1226_v36, %v1242_v52  ;;  %v1254_v39 = vsel %vm188_vm8, %v1246_v56, -inf  ;;  %v1255_v63 = vsel %vm189_vm9, %v1247_v57, -inf  ;;  %v1256_v0 = vsel %vm190_vm12, %v1248_v58, -inf }
 0x308   :  { %v1257_v2 = vsel %vm191_vm13, %v1249_v60, -inf  ;;  %v1258_v28 = vsel %vm192_vm14, %v1250_v62, -inf  ;;  %v1260_v41 = vsel %vm402_vm5, %v1252_v5, -inf  ;;  %v1267_v3 = vsel %vm402_vm5, %v1253_v61, -inf }
 0x309   :  { %v1261_v6 = vrot.slane %v1260_v41, 4  ;;  %v1268_v54 = vrot.slane %v1267_v3, 4  ;;  %v1274_v40 = vsel %vm402_vm5, %v1254_v39, -inf  ;;  %v1281_v45 = vsel %vm402_vm5, %v1255_v63, -inf }
 0x30a   :  { %v1275_v7 = vrot.slane %v1274_v40, 4  ;;  %v1282_v9 = vrot.slane %v1281_v45, 4  ;;  %v1288_v49 = vsel %vm402_vm5, %v1256_v0, -inf  ;;  %v1295_v59 = vsel %vm402_vm5, %v1257_v2, -inf }
 0x30b   :  { %v1262_v10 = vmax.f32 %v1260_v41, %v1261_v6  ;;  %v1269_v35 = vmax.f32 %v1267_v3, %v1268_v54  ;;  %v1289_v4 = vrot.slane %v1288_v49, 4  ;;  %v1296_v12 = vrot.slane %v1295_v59, 4 }
 0x30c   :  { %v1276_v14 = vmax.f32 %v1274_v40, %v1275_v7  ;;  %v1283_v15 = vmax.f32 %v1281_v45, %v1282_v9  ;;  %v1251_v16 = vsel %vm1235_vm10, %v1227_v38, %v1243_v53  ;;  %v1302_v17 = vsel %vm402_vm5, %v1258_v28, -inf }
 0x30d   :  { %v1263_v1 = vrot.slane %v1262_v10, 2  ;;  %v1270_v18 = vrot.slane %v1269_v35, 2  ;;  %v1290_v19 = vmax.f32 %v1288_v49, %v1289_v4  ;;  %vm2119_vm4 = vcmp.gt.f32.partialorder %v1883_v44, 0.5 }
 0x30e   :  { %v1259_v20 = vsel %vm2119_vm4, %v1251_v16, -inf  ;;  %v1277_v11 = vrot.slane %v1276_v14, 2  ;;  %v1284_v13 = vrot.slane %v1283_v15, 2  ;;  %v1297_v21 = vmax.f32 %v1295_v59, %v1296_v12 }
 0x30f   :  { %v1303_v22 = vrot.slane %v1302_v17, 4  ;;  %v1264_v23 = vmax.f32 %v1262_v10, %v1263_v1  ;;  %v1271_v24 = vmax.f32 %v1269_v35, %v1270_v18  ;;  %v1291_v25 = vrot.slane %v1290_v19, 2 }
 0x310   :  { %v1309_v26 = vsel %vm402_vm5, %v1259_v20, -inf  ;;  %v1278_v27 = vmax.f32 %v1276_v14, %v1277_v11  ;;  %v1285_v29 = vmax.f32 %v1283_v15, %v1284_v13  ;;  %v1298_v30 = vrot.slane %v1297_v21, 2 }
 0x311   :  { %v1304_v31 = vmax.f32 %v1302_v17, %v1303_v22  ;;  %v1265_v8 = vrot.slane %v1264_v23, 1  ;;  %v1272_v32 = vrot.slane %v1271_v24, 1  ;;  %v1292_v33 = vmax.f32 %v1290_v19, %v1291_v25 }
 0x312   :  { %v1310_v34 = vrot.slane %v1309_v26, 4  ;;  %v1279_v36 = vrot.slane %v1278_v27, 1  ;;  %v1286_v44 = vrot.slane %v1285_v29, 1  ;;  %v1299_v37 = vmax.f32 %v1297_v21, %v1298_v30 }
 0x313   :  { %v1305_v38 = vrot.slane %v1304_v31, 2  ;;  %v1266_v43 = vmax.f32 %v1264_v23, %v1265_v8  ;;  %v1273_v46 = vmax.f32 %v1271_v24, %v1272_v32  ;;  %v1293_v47 = vrot.slane %v1292_v33, 1 }
 0x314   :  { %v1311_v48 = vmax.f32 %v1309_v26, %v1310_v34  ;;  %v1280_v50 = vmax.f32 %v1278_v27, %v1279_v36  ;;  %v1287_v51 = vmax.f32 %v1285_v29, %v1286_v44  ;;  %v1300_v5 = vrot.slane %v1299_v37, 1 }
 0x315   :  { %v1306_v52 = vmax.f32 %v1304_v31, %v1305_v38  ;;  %vm2120_vm7 = vcmask 1041409   ;;  %v1294_v56 = vmax.f32 %v1292_v33, %v1293_v47  ;;  %vm2121_vm8 = vcmask 1042434  }
 0x316   :  { %v1312_v53 = vrot.slane %v1311_v48, 2  ;;  %v1324_v55 = vsel %vm2120_vm7, %v1273_v46, %v1266_v43  ;;  %v1301_v60 = vmax.f32 %v1299_v37, %v1300_v5  ;;  %vm2122_vm9 = vcmask 1043459  }
 0x317   :  { %v1307_v57 = vrot.slane %v1306_v52, 1  ;;  %v1325_v58 = vsel %vm2121_vm8, %v1280_v50, %v1324_v55  ;;  %vm2123_vm12 = vcmask 1044484   ;;  %vm2124_vm13 = vcmask 1045509  }
 0x318   :  { %v1313_v61 = vmax.f32 %v1311_v48, %v1312_v53  ;;  %v1326_v62 = vsel %vm2122_vm9, %v1287_v51, %v1325_v58  ;;  %vm2125_vm14 = vcmask 1046534   ;;  %vm2126_vm10 = vcmask 1047559  }
 0x319   :  { %v1308_v39 = vmax.f32 %v1306_v52, %v1307_v57  ;;  %v1327_v63 = vsel %vm2123_vm12, %v1294_v56, %v1326_v62  ;;  %vm2127_vm15 = vcmp.gt.f32.partialorder %v1914_v42, 0.0 }
 0x31a   :  { %v1314_v0 = vrot.slane %v1313_v61, 1  ;;  %v1328_v2 = vsel %vm2124_vm13, %v1301_v60, %v1327_v63 }
 0x31b   :  { %v1329_v28 = vsel %vm2125_vm14, %v1308_v39, %v1328_v2 }
 0x31c   :  { %v1315_v41 = vmax.f32 %v1313_v61, %v1314_v0 }
 0x31e   :  { %v1330_v3 = vsel %vm2126_vm10, %v1315_v41, %v1329_v28 }
 0x31f   :  { %v1332_v6 = vsel %vm2127_vm15, %v1330_v3, 0.0 }
 0x320   :  { %1333 = vst.msk [vmem:[#allocation14] sm:$0xff] %vm402_vm5, %v1332_v6 }
 0x321   :  { %1667 = shalt.err (!%p1664_p11)
}
 0x322   :  { %1343 = dma.vmem_to_hbm [thread:$0]  %s1341_s1, 128, %s2102_s10, [#allocation4]  }
 0x323   :  { %1684 = dma.done.wait [#allocation4], 128  }
 0x324   :  { %1685 = vsyncadd [#allocation4], 4294967168 }
 0x325   :  { %1347 = vsyncpa [#allocation3], 1 }
 0x326   :  { %1348 = vsyncpa [#allocation6], 1 }
 0x327   :  { %1349 = vsyncpa [#allocation9], 1 }
 0x328   :  { %1350 = vsyncpa [#allocation12], 1 }
 0x329   :  { %1351 = vsyncpa [#allocation4], 1 }

</bundles_post_ra>
